<compile_context>
chip_gen: v7x
topology: tpu7x:2x2x1
jax: 0.10.0
libtpu: 0.0.40
codegen_flags: <defaults>
</compile_context>

<pallas_src>
import functools
import jax
import jax.numpy as jnp
from jax.experimental import pallas as pl
from jax.experimental.pallas import tpu as pltpu


# ----------------------------------------------------------------------------
# Small helpers
# ----------------------------------------------------------------------------
def _round_up(x, m):
    return ((x + m - 1) // m) * m


def _pad_to(x, shape):
    """Zero-pad `x` up to `shape` (grow-only)."""
    pads = [(0, t - s) for s, t in zip(x.shape, shape)]
    if all(p == (0, 0) for p in pads):
        return x
    return jnp.pad(x, pads)


def _time_block(seq_len, max_block=16):
    """Largest divisor of seq_len that is <= max_block (steps per grid iter)."""
    for cand in range(min(seq_len, max_block), 0, -1):
        if seq_len % cand == 0:
            return cand
    return 1


def _pick_mn_tile(dim, max_tile=512):
    """(tile, padded_dim) for an M/N dimension; small dims use the full extent."""
    if dim <= max_tile:
        return dim, dim
    for t in (512, 384, 256, 128):
        if t <= max_tile and dim % t == 0:
            return t, dim
    return max_tile, _round_up(dim, max_tile)


def _pick_k_tile(dim, max_tile=1024):
    """(tile, padded_dim) for the K dimension; prefer full K or a divisor of K."""
    if dim <= max_tile:
        return dim, dim
    for t in (1024, 768, 512, 384, 256):
        if t <= max_tile and dim % t == 0:
            return t, dim
    return 512, _round_up(dim, 512)


@functools.lru_cache(maxsize=1)
def _vmem_limit_bytes():
    """Explicit scoped-VMEM limit with headroom (critical on v7x's 64 MiB)."""
    try:
        return int(pltpu.get_tpu_info().vmem_capacity_bytes * 3 // 4)
    except Exception:
        return None


# ----------------------------------------------------------------------------
# Pallas kernels: tiled matmul (+ bias, + scale)
# ----------------------------------------------------------------------------
def _matmul_acc_kernel(x_ref, w_ref, b_ref, o_ref, acc_ref, *, scale):
    """o = (x @ w + b) * scale, K tiled, f32 accumulator scratch."""
    k = pl.program_id(2)

    @pl.when(k == 0)
    def _():
        acc_ref[...] = jnp.zeros_like(acc_ref)

    acc_ref[...] += jnp.dot(x_ref[...], w_ref[...],
                            preferred_element_type=jnp.float32)

    @pl.when(k == pl.num_programs(2) - 1)
    def _():
        o_ref[...] = ((acc_ref[...] + b_ref[...]) * scale).astype(o_ref.dtype)


def _matmul_1k_kernel(x_ref, w_ref, b_ref, o_ref, *, scale):
    """Same as above when K fits in one tile: no scratch, single store."""
    acc = jnp.dot(x_ref[...], w_ref[...], preferred_element_type=jnp.float32)
    o_ref[...] = ((acc + b_ref[...]) * scale).astype(o_ref.dtype)


def prepare_linear(w_t, b=None):
    """Pre-cast (bf16) and pre-pad a weight W^T (K, N) and bias once."""
    K, N = w_t.shape
    tk, Kp = _pick_k_tile(K)
    tn, Np = _pick_mn_tile(N)
    wp = _pad_to(jnp.asarray(w_t, jnp.float32).astype(jnp.bfloat16), (Kp, Np))
    bv = jnp.zeros((N,), jnp.float32) if b is None else jnp.asarray(b, jnp.float32)
    bp = _pad_to(bv.reshape(1, N), (1, Np))
    return dict(wp=wp, bp=bp, tk=tk, tn=tn, Kp=Kp, Np=Np, K=K, N=N)


def apply_linear(x, lin, *, scale=1.0, out_dtype=jnp.float32):
    """(x @ W^T + b) * scale with bf16 MXU operands and f32 accumulation."""
    M, K = x.shape
    assert K == lin["K"]
    tm, Mp = _pick_mn_tile(M)
    tn, tk, Kp, Np = lin["tn"], lin["tk"], lin["Kp"], lin["Np"]
    xp = _pad_to(jnp.asarray(x).astype(jnp.bfloat16), (Mp, Kp))

    grid = (Mp // tm, Np // tn, Kp // tk)
    if grid[2] == 1:
        kernel = functools.partial(_matmul_1k_kernel, scale=float(scale))
        scratch = []
    else:
        kernel = functools.partial(_matmul_acc_kernel, scale=float(scale))
        scratch = [pltpu.VMEM((tm, tn), jnp.float32)]

    out = pl.pallas_call(
        kernel,
        out_shape=jax.ShapeDtypeStruct((Mp, Np), out_dtype),
        grid_spec=pltpu.PrefetchScalarGridSpec(
            num_scalar_prefetch=0,
            grid=grid,
            in_specs=[pl.BlockSpec((tm, tk), lambda i, j, k: (i, k)),
                      pl.BlockSpec((tk, tn), lambda i, j, k: (k, j)),
                      pl.BlockSpec((1, tn), lambda i, j, k: (0, j))],
            out_specs=pl.BlockSpec((tm, tn), lambda i, j, k: (i, j)),
            scratch_shapes=scratch),
        compiler_params=pltpu.CompilerParams(
            dimension_semantics=("parallel", "parallel", "arbitrary"),
            vmem_limit_bytes=_vmem_limit_bytes()),
    )(xp, lin["wp"], lin["bp"])
    return out[:M, :lin["N"]]


# ----------------------------------------------------------------------------
# Pallas kernels: LSTM recurrence
# ----------------------------------------------------------------------------
def _sigm(x):
    # sigmoid(x) == 0.5 * (tanh(x / 2) + 1): one EUP op instead of exp + recip.
    return 0.5 * (jnp.tanh(0.5 * x) + 1.0)


def _lstm_cell(gates, c_prev, hidden):
    i_g = _sigm(gates[:, 0 * hidden:1 * hidden])
    f_g = _sigm(gates[:, 1 * hidden:2 * hidden])
    g_g = jnp.tanh(gates[:, 2 * hidden:3 * hidden])
    o_g = _sigm(gates[:, 3 * hidden:4 * hidden])
    c_new = f_g * c_prev + i_g * g_g
    h_new = o_g * jnp.tanh(c_new)
    return h_new, c_new


def lstm_bi_kernel(gxf_ref, gxb_ref, whhf_ref, whhb_ref, h0_ref, c0_ref,
                   yf_ref, yb_ref, hT_ref, cT_ref,
                   hf_scr, cf_scr, hb_scr, cb_scr, *, t_block):
    """Both directions of a bidirectional LSTM, fused into one grid step.

    gxf_ref / gxb_ref : (T_b, Bp, 4H) bf16 precomputed input projections
                        (bwd block already time-reversed via the index_map)
    whhf/whhb         : (H, 4H) bf16 resident recurrent weights
    h0/c0             : (2, Bp, H) f32 initial states
    yf/yb             : (T_b, Bp, H) bf16 hidden outputs per direction
    hT/cT             : (2, Bp, H) f32 final states (written on last block)
    """
    hidden = whhf_ref.shape[0]
    tb = pl.program_id(0)

    @pl.when(tb == 0)
    def _():
        hf_scr[...] = h0_ref[0]
        cf_scr[...] = c0_ref[0]
        hb_scr[...] = h0_ref[1]
        cb_scr[...] = c0_ref[1]

    h_f, c_f = hf_scr[...], cf_scr[...]
    h_b, c_b = hb_scr[...], cb_scr[...]

    # Static (Python-unrolled) time loop; fwd & bwd interleave so the MXU fill
    # of one direction overlaps the VPU/EUP gate math of the other.
    for j in range(t_block):
        rb = t_block - 1 - j          # bwd direction walks this block in reverse
        gates_f = gxf_ref[j].astype(jnp.float32) + jnp.dot(
            h_f.astype(jnp.bfloat16), whhf_ref[...],
            preferred_element_type=jnp.float32)
        gates_b = gxb_ref[rb].astype(jnp.float32) + jnp.dot(
            h_b.astype(jnp.bfloat16), whhb_ref[...],
            preferred_element_type=jnp.float32)
        h_f, c_f = _lstm_cell(gates_f, c_f, hidden)
        h_b, c_b = _lstm_cell(gates_b, c_b, hidden)
        yf_ref[j] = h_f.astype(yf_ref.dtype)
        yb_ref[rb] = h_b.astype(yb_ref.dtype)

    hf_scr[...], cf_scr[...] = h_f, c_f
    hb_scr[...], cb_scr[...] = h_b, c_b

    @pl.when(tb == pl.num_programs(0) - 1)
    def _():
        hT_ref[0] = h_f
        hT_ref[1] = h_b
        cT_ref[0] = c_f
        cT_ref[1] = c_b


def lstm_uni_kernel(gx_ref, whh_ref, h0_ref, c0_ref, y_ref, hT_ref, cT_ref,
                    h_scr, c_scr, *, t_block):
    """Unidirectional LSTM recurrence over one block of t_block time steps."""
    hidden = whh_ref.shape[0]
    tb = pl.program_id(0)

    @pl.when(tb == 0)
    def _():
        h_scr[...] = h0_ref[...]
        c_scr[...] = c0_ref[...]

    h, c = h_scr[...], c_scr[...]
    for j in range(t_block):
        gates = gx_ref[j].astype(jnp.float32) + jnp.dot(
            h.astype(jnp.bfloat16), whh_ref[...],
            preferred_element_type=jnp.float32)
        h, c = _lstm_cell(gates, c, hidden)
        y_ref[j] = h.astype(y_ref.dtype)
    h_scr[...], c_scr[...] = h, c

    @pl.when(tb == pl.num_programs(0) - 1)
    def _():
        hT_ref[...] = h
        cT_ref[...] = c


# ----------------------------------------------------------------------------
# Kernel wrappers
# ----------------------------------------------------------------------------
def lstm_bi_scan(gx, whh_f, whh_b, h0, c0, *, hh, fused_gx):
    """Bidirectional LSTM recurrence (both directions per grid step).

    gx: if fused_gx -> (S, Bp, 8*hh) bf16 (fwd gates lanes [0,4hh), bwd [4hh,8hh))
        else        -> tuple (gx_f, gx_b), each (S, Bp, 4*hh) bf16
    whh_f/whh_b: (hh, 4*hh) bf16, h0/c0: (2, Bp, hh) f32.
    Returns y_f, y_b (S, Bp, hh) bf16 and hT, cT (2, Bp, hh) f32.
    """
    if fused_gx:
        gx_f_arr = gx_b_arr = gx
        S, Bp, _ = gx.shape
        bwd_lane_block = 1
    else:
        gx_f_arr, gx_b_arr = gx
        S, Bp, _ = gx_f_arr.shape
        bwd_lane_block = 0
    T_b = _time_block(S)
    NT = S // T_b

    gxf_spec = pl.BlockSpec((T_b, Bp, 4 * hh), lambda t: (t, 0, 0))
    gxb_spec = pl.BlockSpec((T_b, Bp, 4 * hh),
                            lambda t: (NT - 1 - t, 0, bwd_lane_block))

    y_f, y_b, hT, cT = pl.pallas_call(
        functools.partial(lstm_bi_kernel, t_block=T_b),
        out_shape=(jax.ShapeDtypeStruct((S, Bp, hh), jnp.bfloat16),
                   jax.ShapeDtypeStruct((S, Bp, hh), jnp.bfloat16),
                   jax.ShapeDtypeStruct((2, Bp, hh), jnp.float32),
                   jax.ShapeDtypeStruct((2, Bp, hh), jnp.float32)),
        grid_spec=pltpu.PrefetchScalarGridSpec(
            num_scalar_prefetch=0,
            grid=(NT,),
            in_specs=[gxf_spec, gxb_spec,
                      pl.BlockSpec((hh, 4 * hh), lambda t: (0, 0)),
                      pl.BlockSpec((hh, 4 * hh), lambda t: (0, 0)),
                      pl.BlockSpec((2, Bp, hh), lambda t: (0, 0, 0)),
                      pl.BlockSpec((2, Bp, hh), lambda t: (0, 0, 0))],
            out_specs=(pl.BlockSpec((T_b, Bp, hh), lambda t: (t, 0, 0)),
                       pl.BlockSpec((T_b, Bp, hh), lambda t: (NT - 1 - t, 0, 0)),
                       pl.BlockSpec((2, Bp, hh), lambda t: (0, 0, 0)),
                       pl.BlockSpec((2, Bp, hh), lambda t: (0, 0, 0))),
            scratch_shapes=[pltpu.VMEM((Bp, hh), jnp.float32)] * 4),
        compiler_params=pltpu.CompilerParams(
            dimension_semantics=("arbitrary",),
            vmem_limit_bytes=_vmem_limit_bytes()),
    )(gx_f_arr, gx_b_arr, whh_f, whh_b, h0, c0)
    return y_f, y_b, hT, cT


def lstm_uni_scan(gx, whh, h0, c0):
    """Unidirectional LSTM recurrence over a pre-projected sequence.

    gx: (S, Bp, 4H) bf16, whh: (H, 4H) bf16, h0/c0: (Bp, H) f32.
    Returns y (S, Bp, H) bf16 and hT, cT (Bp, H) f32.
    """
    S, Bp, G4 = gx.shape
    H = G4 // 4
    T_b = _time_block(S)
    NT = S // T_b

    # TODO(synk): on v7x, split Bp across the two TensorCores (core-parallel)
    # so both cores work on the decoder recurrence.
    y, hT, cT = pl.pallas_call(
        functools.partial(lstm_uni_kernel, t_block=T_b),
        out_shape=(jax.ShapeDtypeStruct((S, Bp, H), jnp.bfloat16),
                   jax.ShapeDtypeStruct((Bp, H), jnp.float32),
                   jax.ShapeDtypeStruct((Bp, H), jnp.float32)),
        grid_spec=pltpu.PrefetchScalarGridSpec(
            num_scalar_prefetch=0,
            grid=(NT,),
            in_specs=[pl.BlockSpec((T_b, Bp, G4), lambda t: (t, 0, 0)),
                      pl.BlockSpec((H, G4), lambda t: (0, 0)),
                      pl.BlockSpec((Bp, H), lambda t: (0, 0)),
                      pl.BlockSpec((Bp, H), lambda t: (0, 0))],
            out_specs=(pl.BlockSpec((T_b, Bp, H), lambda t: (t, 0, 0)),
                       pl.BlockSpec((Bp, H), lambda t: (0, 0)),
                       pl.BlockSpec((Bp, H), lambda t: (0, 0))),
            scratch_shapes=[pltpu.VMEM((Bp, H), jnp.float32)] * 2),
        compiler_params=pltpu.CompilerParams(
            dimension_semantics=("arbitrary",),
            vmem_limit_bytes=_vmem_limit_bytes()),
    )(gx, whh, h0, c0)
    return y, hT, cT


# ----------------------------------------------------------------------------
# Parameter construction (deterministic, PyTorch-default-style init)
# ----------------------------------------------------------------------------
def _lstm_dir_params(key, in_size, hidden):
    """Returns (W_ih^T (in,4H), W_hh^T (H,4H), b_ih + b_hh (4H,))."""
    bound = 1.0 / (hidden ** 0.5)
    k0, k1, k2, k3 = jax.random.split(key, 4)
    w_ih = jax.random.uniform(k0, (4 * hidden, in_size), jnp.float32, -bound, bound)
    w_hh = jax.random.uniform(k1, (4 * hidden, hidden), jnp.float32, -bound, bound)
    b_ih = jax.random.uniform(k2, (4 * hidden,), jnp.float32, -bound, bound)
    b_hh = jax.random.uniform(k3, (4 * hidden,), jnp.float32, -bound, bound)
    return w_ih.T, w_hh.T, b_ih + b_hh


# ----------------------------------------------------------------------------
# Model
# ----------------------------------------------------------------------------
class LSTMGLatestPallas:
    def __init__(self, *, batch_size, n_layers_G, hidden_size, vocab_size,
                 seq_length, gamma, pad_token_id, d_model, key):
        assert d_model == hidden_size, "lm_head(d_model) is applied to hidden_size vectors"
        self.num_layers = n_layers_G
        self.hidden_size = hidden_size
        self.hh = hidden_size // 2
        self.vocab_size = vocab_size
        self.gamma = gamma
        self.pad_token_id = pad_token_id
        self.d_model = d_model

        # TODO(synk): the frozen pretrained BART/BERT/T5 encoder has no clean
        # Pallas equivalent here; it is replaced by a deterministic embedding table.
        key, ke = jax.random.split(key)
        self.emb_table = jax.random.normal(ke, (vocab_size, d_model), jnp.float32) * 0.02

        hh = self.hh
        # Fused fwd/bwd input projection only when the gate slab is lane aligned.
        self.enc_fused_gx = (4 * hh) % 128 == 0

        # Encoder E: bidirectional, hidden = hidden_size // 2.
        self.E_layers = []
        for layer in range(n_layers_G):
            in_sz = d_model if layer == 0 else hidden_size
            key, kf, kb = jax.random.split(key, 3)
            wih_f, whh_f, b_f = _lstm_dir_params(kf, in_sz, hh)
            wih_b, whh_b, b_b = _lstm_dir_params(kb, in_sz, hh)
            layer_p = dict(whh_f=whh_f.astype(jnp.bfloat16),
                           whh_b=whh_b.astype(jnp.bfloat16))
            if self.enc_fused_gx:
                layer_p["lin"] = prepare_linear(
                    jnp.concatenate([wih_f, wih_b], axis=1),
                    jnp.concatenate([b_f, b_b], axis=0))
            else:
                layer_p["lin_f"] = prepare_linear(wih_f, b_f)
                layer_p["lin_b"] = prepare_linear(wih_b, b_b)
            self.E_layers.append(layer_p)

        # Decoder D: unidirectional, hidden = hidden_size.
        self.D_layers = []
        for layer in range(n_layers_G):
            key, kd = jax.random.split(key)
            wih_d, whh_d, b_d = _lstm_dir_params(kd, hidden_size, hidden_size)
            self.D_layers.append(dict(lin=prepare_linear(wih_d, b_d),
                                      whh=whh_d.astype(jnp.bfloat16)))

        # lm_head: Linear(d_model, vocab_size, bias=False), init uniform(-1, 1).
        key, kl = jax.random.split(key)
        lm_w_t = jax.random.uniform(kl, (d_model, vocab_size), jnp.float32, -1.0, 1.0)
        self.lm_lin = prepare_linear(lm_w_t, None)

    def forward(self, input_seq, input_mask, hidden_in=None, mem_in=None):
        del input_mask  # only consumed by the frozen pretrained embedding (replaced)
        B, S = input_seq.shape
        H, Hh, L = self.hidden_size, self.hh, self.num_layers
        Bp = _round_up(B, 8)                 # sublane-aligned batch

        if hidden_in is None:
            hidden_in = jnp.zeros((L * 2, B, Hh), jnp.float32)
            mem_in = jnp.zeros((L * 2, B, Hh), jnp.float32)

        # input_seq[input_seq == -100] = pad_token_id
        input_seq = jnp.where(input_seq == -100, self.pad_token_id, input_seq)

        # Embedding lookup (stand-in for the frozen pretrained encoder).
        embs = jnp.take(self.emb_table, input_seq, axis=0)            # (B, S, D)

        # Time-major layout, batch zero-padded to a multiple of 8 sublanes.
        x = jnp.transpose(embs, (1, 0, 2))                            # (S, B, D)
        x = _pad_to(x, (S, Bp, x.shape[-1])).astype(jnp.bfloat16)

        h0 = _pad_to(jnp.asarray(hidden_in, jnp.float32).reshape(L, 2, B, Hh),
                     (L, 2, Bp, Hh))
        c0 = _pad_to(jnp.asarray(mem_in, jnp.float32).reshape(L, 2, B, Hh),
                     (L, 2, Bp, Hh))

        # ---- Encoder E: bidirectional multi-layer LSTM ----
        layer_in = x
        h_parts, c_parts = [], []
        for l in range(L):
            p = self.E_layers[l]
            x2d = layer_in.reshape(S * Bp, layer_in.shape[-1])
            if self.enc_fused_gx:
                gx = apply_linear(x2d, p["lin"], out_dtype=jnp.bfloat16)
                gx_in = gx.reshape(S, Bp, 8 * Hh)
            else:
                gx_f = apply_linear(x2d, p["lin_f"], out_dtype=jnp.bfloat16)
                gx_b = apply_linear(x2d, p["lin_b"], out_dtype=jnp.bfloat16)
                gx_in = (gx_f.reshape(S, Bp, 4 * Hh), gx_b.reshape(S, Bp, 4 * Hh))
            y_f, y_b, hT, cT = lstm_bi_scan(gx_in, p["whh_f"], p["whh_b"],
                                            h0[l], c0[l], hh=Hh,
                                            fused_gx=self.enc_fused_gx)
            layer_in = jnp.concatenate([y_f, y_b], axis=-1)           # (S, Bp, H) bf16
            h_parts.append(hT)                                        # (2, Bp, Hh)
            c_parts.append(cT)

        y_enc = layer_in                                              # (S, Bp, H) bf16
        output_e = jnp.transpose(y_enc[:, :B], (1, 0, 2)).astype(jnp.float32)
        hidden_e = jnp.concatenate(h_parts, axis=0)[:, :B]            # (2L, B, Hh)
        mem_e = jnp.concatenate(c_parts, axis=0)[:, :B]

        # Exact PyTorch reshapes (row-major) -- mixes direction and batch for
        # B > 1, matching the reference module's quirk.
        output_e = output_e.reshape(B, S, -1)
        hidden_e_r = hidden_e.reshape(L, B, -1)                       # (L, B, H)
        mem_e_r = mem_e.reshape(L, B, -1)

        # ---- Decoder D: unidirectional multi-layer LSTM ----
        h0_d = _pad_to(hidden_e_r, (L, Bp, H))
        c0_d = _pad_to(mem_e_r, (L, Bp, H))
        layer_in = y_enc                                              # padded rows don't-care
        for l in range(L):
            p = self.D_layers[l]
            gx = apply_linear(layer_in.reshape(S * Bp, H), p["lin"],
                              out_dtype=jnp.bfloat16).reshape(S, Bp, 4 * H)
            layer_in, _, _ = lstm_uni_scan(gx, p["whh"], h0_d[l], c0_d[l])

        out_bSH = jnp.transpose(layer_in[:, :B], (1, 0, 2))           # (B, S, H) bf16
        output = out_bSH.astype(jnp.float32)

        # dropout -> identity (eval mode)
        sents = output.reshape(B, -1, H)

        # lm_head; 1/gamma scale folded into the tiled matmul kernel.
        logits2d = apply_linear(out_bSH.reshape(B * S, H), self.lm_lin,
                                scale=1.0 / self.gamma)               # (B*S, V) f32
        logits3d = logits2d.reshape(B, S, self.vocab_size)
        gen_tokens = jnp.argmax(logits3d, axis=2).astype(jnp.int32)

        return {
            "logits": logits3d.reshape(-1, self.vocab_size),
            "gen_tokens": gen_tokens,
            "decoder_hidden_state": sents,
            "encoder_last_hidden_state": output_e,
            "lstm_hidden_state": hidden_e_r.reshape(L * 2, B, -1),
            "lstm_memory": mem_e_r.reshape(L * 2, B, -1),
        }


# ----------------------------------------------------------------------------
# Pure-JAX reference (matched precision) for structural correctness checking
# ----------------------------------------------------------------------------
def reference_forward(model, input_seq):
    B, S = input_seq.shape
    L, H, Hh = model.num_layers, model.hidden_size, model.hh
    f32, bf16 = jnp.float32, jnp.bfloat16

    def linear(x2d, lin, scale=1.0):
        w = lin["wp"][:lin["K"], :lin["N"]]
        b = lin["bp"][0, :lin["N"]]
        y = jnp.dot(x2d.astype(bf16), w, preferred_element_type=f32)
        return (y + b) * scale

    def cell(gates, c, hd):
        i = jax.nn.sigmoid(gates[:, :hd])
        f = jax.nn.sigmoid(gates[:, hd:2 * hd])
        g = jnp.tanh(gates[:, 2 * hd:3 * hd])
        o = jax.nn.sigmoid(gates[:, 3 * hd:])
        c = f * c + i * g
        return o * jnp.tanh(c), c

    seq = jnp.where(input_seq == -100, model.pad_token_id, input_seq)
    x = jnp.take(model.emb_table, seq, axis=0).astype(bf16)           # (B, S, D)

    h_list, c_list = [], []
    for l in range(L):
        p = model.E_layers[l]
        x2d = x.reshape(B * S, x.shape[-1])
        if model.enc_fused_gx:
            gx = linear(x2d, p["lin"]).astype(bf16).reshape(B, S, 8 * Hh)
            gx_f, gx_b = gx[..., :4 * Hh], gx[..., 4 * Hh:]
        else:
            gx_f = linear(x2d, p["lin_f"]).astype(bf16).reshape(B, S, 4 * Hh)
            gx_b = linear(x2d, p["lin_b"]).astype(bf16).reshape(B, S, 4 * Hh)
        hf = jnp.zeros((B, Hh), f32); cf = jnp.zeros((B, Hh), f32)
        hb = jnp.zeros((B, Hh), f32); cb = jnp.zeros((B, Hh), f32)
        ys_f, ys_b = [], [None] * S
        for t in range(S):
            g = gx_f[:, t].astype(f32) + jnp.dot(hf.astype(bf16), p["whh_f"],
                                                 preferred_element_type=f32)
            hf, cf = cell(g, cf, Hh)
            ys_f.append(hf.astype(bf16))
        for t in range(S - 1, -1, -1):
            g = gx_b[:, t].astype(f32) + jnp.dot(hb.astype(bf16), p["whh_b"],
                                                 preferred_element_type=f32)
            hb, cb = cell(g, cb, Hh)
            ys_b[t] = hb.astype(bf16)
        x = jnp.stack([jnp.concatenate([ys_f[t], ys_b[t]], axis=-1)
                       for t in range(S)], axis=1)                    # (B, S, H) bf16
        h_list += [hf, hb]
        c_list += [cf, cb]

    output_e = x.astype(f32)
    hidden_e = jnp.stack(h_list)                                      # (2L, B, Hh)
    mem_e = jnp.stack(c_list)
    hidden_e_r = hidden_e.reshape(L, B, -1)
    mem_e_r = mem_e.reshape(L, B, -1)

    for l in range(L):
        p = model.D_layers[l]
        gx = linear(x.reshape(B * S, H), p["lin"]).astype(bf16).reshape(B, S, 4 * H)
        h, c = hidden_e_r[l], mem_e_r[l]
        ys = []
        for t in range(S):
            g = gx[:, t].astype(f32) + jnp.dot(h.astype(bf16), p["whh"],
                                               preferred_element_type=f32)
            h, c = cell(g, c, H)
            ys.append(h.astype(bf16))
        x = jnp.stack(ys, axis=1)                                     # (B, S, H) bf16

    logits = linear(x.reshape(B * S, H), model.lm_lin, scale=1.0 / model.gamma)
    return {
        "logits": logits,
        "decoder_hidden_state": x.astype(f32).reshape(B, -1, H),
        "encoder_last_hidden_state": output_e,
        "lstm_hidden_state": hidden_e_r.reshape(L * 2, B, -1),
    }


# ----------------------------------------------------------------------------
# Demo
# ----------------------------------------------------------------------------
def _max_abs_diff(a, b):
    return float(jnp.max(jnp.abs(jnp.asarray(a, jnp.float32) -
                                 jnp.asarray(b, jnp.float32))))


def _run_config(key, *, batch, seq, hidden, d_model, vocab, n_layers, gamma, name):
    key, km = jax.random.split(key)
    model = LSTMGLatestPallas(
        batch_size=batch, n_layers_G=n_layers, hidden_size=hidden,
        vocab_size=vocab, seq_length=seq, gamma=gamma,
        pad_token_id=0, d_model=d_model, key=km)

    key, ki = jax.random.split(key)
    input_seq = jax.random.randint(ki, (batch, seq), 0, vocab, dtype=jnp.int32)
    input_seq = input_seq.at[0, -1].set(-100).at[1, -2].set(-100)
    input_mask = jnp.ones((batch, seq), jnp.int32)

    out = model.forward(input_seq, input_mask)
    jax.block_until_ready(out)

    assert out["logits"].shape == (batch * seq, vocab)
    assert out["gen_tokens"].shape == (batch, seq)
    assert out["decoder_hidden_state"].shape == (batch, seq, hidden)
    assert out["encoder_last_hidden_state"].shape == (batch, seq, hidden)
    assert out["lstm_hidden_state"].shape == (n_layers * 2, batch, hidden // 2)
    assert out["lstm_memory"].shape == (n_layers * 2, batch, hidden // 2)
    assert bool(jnp.all(jnp.isfinite(out["logits"])))

    # Structural-correctness check against a matched-precision pure-JAX reference.
    ref = reference_forward(model, input_seq)
    for k, tol in (("encoder_last_hidden_state", 5e-2),
                   ("decoder_hidden_state", 5e-2),
                   ("lstm_hidden_state", 5e-2),
                   ("logits", 1e-1)):
        d = _max_abs_diff(out[k], ref[k])
        assert d < tol, f"[{name}] {k}: max|diff| = {d} >= {tol}"
    return key


if __name__ == "__main__":
    key = jax.random.PRNGKey(0)
    # Config 1: H=32 (4*Hh = 64 -> un-fused gx path, per-direction projections).
    key = _run_config(key, batch=2, seq=8, hidden=32, d_model=32, vocab=64,
                      n_layers=2, gamma=1.5, name="cfg_unfused")
    # Config 2: H=64 (4*Hh = 128 -> lane-aligned fused fwd/bwd projection path).
    key = _run_config(key, batch=2, seq=8, hidden=64, d_model=64, vocab=32,
                      n_layers=1, gamma=2.0, name="cfg_fused")
    print("KERNEL_OK")
</pallas_src>

<mosaic_0001>
module attributes {stable_mosaic.version = 11 : i64} {
  func.func @_matmul_1k_kernel(%arg0: i32, %arg1: i32, %arg2: i32, %arg3: memref<64x32xbf16, #tpu.memory_space<vmem>>, %arg4: memref<32x64xbf16, #tpu.memory_space<vmem>>, %arg5: memref<1x64xf32, #tpu.memory_space<vmem>>, %arg6: memref<64x64xbf16, #tpu.memory_space<vmem>>) attributes {dimension_semantics = [#tpu.dimension_semantics<parallel>, #tpu.dimension_semantics<parallel>, #tpu.dimension_semantics<arbitrary>], iteration_bounds = array<i64: 1, 1, 1>, scalar_prefetch = 0 : i64, scratch_operands = 0 : i64, tpu.core_type = #tpu.core_type<tc>, window_params = [{transform_indices = @transform_0, window_bounds = array<i64: 64, 32>}, {transform_indices = @transform_1, window_bounds = array<i64: 32, 64>}, {transform_indices = @transform_2, window_bounds = array<i64: 1, 64>}, {transform_indices = @transform_3, window_bounds = array<i64: 64, 64>}]} {
    %c0 = arith.constant 0 : index
    %c0_0 = arith.constant 0 : index
    %0 = vector.load %arg3[%c0, %c0_0] : memref<64x32xbf16, #tpu.memory_space<vmem>>, vector<64x32xbf16>
    %c0_1 = arith.constant 0 : index
    %c0_2 = arith.constant 0 : index
    %1 = vector.load %arg4[%c0_1, %c0_2] : memref<32x64xbf16, #tpu.memory_space<vmem>>, vector<32x64xbf16>
    %cst = arith.constant dense<0.000000e+00> : vector<64x64xf32>
    %2 = tpu.matmul %0, %1, %cst {dimension_numbers = #tpu.dot_dimension_numbers<[1], [0], [0], [1], [0, 0, 1, 1], [], []>} : vector<64x32xbf16>, vector<32x64xbf16>, vector<64x64xf32> -> vector<64x64xf32>
    %c0_3 = arith.constant 0 : index
    %c0_4 = arith.constant 0 : index
    %3 = vector.load %arg5[%c0_3, %c0_4] : memref<1x64xf32, #tpu.memory_space<vmem>>, vector<1x64xf32>
    %4 = vector.broadcast %3 : vector<1x64xf32> to vector<64x64xf32>
    %5 = arith.addf %2, %4 : vector<64x64xf32>
    %cst_5 = arith.constant 1.000000e+00 : f32
    %6 = vector.broadcast %cst_5 : f32 to vector<64x64xf32>
    %7 = arith.mulf %5, %6 : vector<64x64xf32>
    %8 = arith.truncf %7 : vector<64x64xf32> to vector<64x64xbf16>
    %c0_6 = arith.constant 0 : index
    %c0_7 = arith.constant 0 : index
    %9 = vector.load %arg6[%c0_6, %c0_7] : memref<64x64xbf16, #tpu.memory_space<vmem>>, vector<64x64xbf16>
    tpu.vector_store %arg6[%c0_6, %c0_7], %8 {strides = array<i32>} : memref<64x64xbf16, #tpu.memory_space<vmem>>, vector<64x64xbf16>,
    return
  }
  func.func @transform_0(%arg0: i32, %arg1: i32, %arg2: i32) -> (i32, i32) {
    %c0_i32 = arith.constant 0 : i32
    return %arg0, %arg2 : i32, i32
  }
  func.func @transform_1(%arg0: i32, %arg1: i32, %arg2: i32) -> (i32, i32) {
    %c0_i32 = arith.constant 0 : i32
    return %arg2, %arg1 : i32, i32
  }
  func.func @transform_2(%arg0: i32, %arg1: i32, %arg2: i32) -> (i32, i32) {
    %c0_i32 = arith.constant 0 : i32
    %c0_i32_0 = arith.constant 0 : i32
    return %c0_i32, %arg1 : i32, i32
  }
  func.func @transform_3(%arg0: i32, %arg1: i32, %arg2: i32) -> (i32, i32) {
    %c0_i32 = arith.constant 0 : i32
    return %arg0, %arg1 : i32, i32
  }
}

</mosaic_0001>

<bundles_post_ra>
// kernel: tpu_custom_call.1
= control target key start
LH: loop header
LB: loop body
LE: loop exit
PB: predicated region body
PF: predicated region fallthrough
CT: control target
= control target key end

     0   :  { %vm67_vm0 = vcmask 261120   ;;  %s348_s0 = inlined_call_operand.vmem [shape: bf16[64,32], index: 0, kind: input, shape index: {}]   ;;  %s349_s1 = inlined_call_operand.vmem [shape: bf16[32,64], index: 1, kind: input, shape index: {}]   ;;  %s350_s2 = inlined_call_operand.vmem [shape: f32[1,64], index: 2, kind: input, shape index: {}]   ;;  %s351_s3 = inlined_call_operand.hbm [shape: bf16[64,64], index: 3, kind: output, shape index: {}]  }
   0x1   :  { %v254_v0 = vld [vmem:[%s349_s1] sm:$0xff]   ;;  %v255_v1 = vld [vmem:[%s349_s1 + $0x8] sm:$0xff]   ;;  %v257_v3 = vld [vmem:[%s348_s0 + $0x10] sm:$0xff]  }
   0x2   :  { %235 = vmatprep.subr.bf16.mxu0 %v254_v0  ;;  %247 = vmatprep.subr.bf16.mxu1 %v254_v0  ;;  %v256_v2 = vld [vmem:[%s348_s0] sm:$0xff]   ;;  %v258_v4 = vld [vmem:[%s348_s0 + $0x8] sm:$0xff]   ;;  %v259_v5 = vld [vmem:[%s348_s0 + $0x18] sm:$0xff]  }
   0x3   :  { %236 = vmatpush3.bf16.msra.mxu0 %v254_v0  ;;  %249 = vmatpush3.bf16.msra.mxu1 %v254_v0 }
   0x4   :  { %237 = vmatprep.subr.bf16.mxu0 %v255_v1  ;;  %248 = vmatprep.subr.bf16.mxu1 %v255_v1 }
   0x5   :  { %239 = vmatprep.mubr.msk.bf16.mxu0 %vm67_vm0, %v256_v2  ;;  %243 = vmatprep.mubr.msk.bf16.mxu1 %vm67_vm0, %v257_v3 }
   0x6   :  { %8 = vsyncpa [#allocation3], 0  ;;  %v202_v6 = vld [vmem:[%s350_s2] ss:$0 sm:$0xff]  ;;  %vm177_vm1 = vcmask 519168   ;;  %s284_s0 = smov [#allocation2]  }
   0x7   :  { %238 = vmatpush3.bf16.msra.mxu0 %v255_v1  ;;  %250 = vmatpush3.bf16.msra.mxu1 %v255_v1  ;;  %s191_s25 = sshll.u32 %s284_s0, 4  ;;  %s192_s25 = int_to_ptr.vmem [resolvable:$true] %s191_s25 }
   0x8   :  { %s260_s2 = scalar_lea.vmem %s192_s25, 512  ;;  %p265_p1 = scmp.lt.s32.totalorder %s192_s25, %s192_s25 }
   0x9   :  { %p261_p0 = scmp.ne.s32.totalorder %s192_s25, %s260_s2  ;;  %p266_p2 = scmp.lt.s32.totalorder %s260_s2, %s260_s2 }
   0xa   :  { %240 = vmatmul.mubr.msk.bf16.vlgmr.msra.gmra.mrb[0].mxu0 %vm67_vm0, %v258_v4  ;;  %244 = vmatmul.mubr.msk.bf16.vlgmr.msra.gmra.mrb[0].mxu1 %vm67_vm0, %v259_v5 }
   0xb   :  { %p267_p3 = por %p266_p2, %p265_p1 }
   0xd   :  { %p268_p4 = pnand %p267_p3, %p261_p0 }
  0xdd   :  { %v241_v7 = vpop.f32.mrb[0].mxu0  ;;  %v245_v8 = vpop.f32.mrb[0].mxu1 }
  0xde   :  { %v123_v9 = vadd.f32 %v241_v7, %v202_v6  ;;  %v139_v10 = vadd.f32 %v245_v8, %v202_v6  ;;  %v114_v11 = vpop.f32.mrb[1].mxu0  ;;  %v130_v12 = vpop.f32.mrb[1].mxu1 }
  0xdf   :  { %v115_v13 = vadd.f32 %v202_v6, %v114_v11  ;;  %v131_v14 = vadd.f32 %v202_v6, %v130_v12  ;;  %v242_v15 = vpop.f32.mrb[2].mxu0  ;;  %v246_v16 = vpop.f32.mrb[2].mxu1 }
  0xe0   :  { %v223_v17 = vpack.c.bf16 %v123_v9, %v123_v9  ;;  %v227_v18 = vpack.c.bf16 %v139_v10, %v139_v10  ;;  %v126_v19 = vadd.f32 %v242_v15, %v202_v6  ;;  %v142_v20 = vadd.f32 %v246_v16, %v202_v6  ;;  %v117_v21 = vpop.f32.mrb[3].mxu0  ;;  %v133_v22 = vpop.f32.mrb[3].mxu1 }
  0xe1   :  { %v221_v23 = vpack.c.bf16 %v115_v13, %v115_v13  ;;  %v225_v24 = vpack.c.bf16 %v131_v14, %v131_v14  ;;  %v118_v25 = vadd.f32 %v202_v6, %v117_v21  ;;  %v134_v26 = vadd.f32 %v202_v6, %v133_v22 }
  0xe2   :  { %180 = vst.msk [vmem:[#allocation2 + $0x8] sm:$0xf] %vm177_vm1, %v223_v17  ;;  %184 = vst.msk [vmem:[#allocation2 + $0x18] sm:$0xf] %vm177_vm1, %v227_v18  ;;  %v224_v27 = vpack.c.bf16 %v126_v19, %v126_v19  ;;  %v228_v28 = vpack.c.bf16 %v142_v20, %v142_v20 }
  0xe3   :  { %178 = vst.msk [vmem:[#allocation2] sm:$0xf] %vm177_vm1, %v221_v23  ;;  %182 = vst.msk [vmem:[#allocation2 + $0x10] sm:$0xf] %vm177_vm1, %v225_v24  ;;  %v222_v29 = vpack.c.bf16 %v118_v25, %v118_v25  ;;  %v226_v30 = vpack.c.bf16 %v134_v26, %v134_v26 }
  0xe4   :  { %181 = vst.msk [vmem:[#allocation2 + $0xc] sm:$0xf] %vm177_vm1, %v224_v27  ;;  %185 = vst.msk [vmem:[#allocation2 + $0x1c] sm:$0xf] %vm177_vm1, %v228_v28 }
  0xe5   :  { %179 = vst.msk [vmem:[#allocation2 + $0x4] sm:$0xf] %vm177_vm1, %v222_v29  ;;  %183 = vst.msk [vmem:[#allocation2 + $0x14] sm:$0xf] %vm177_vm1, %v226_v30 }
  0xe6   :  { %271 = shalt.err (!%p268_p4)
}
  0xe7   :  { %s272_s28 = scalar_lea.hbm %s351_s3, 512 }
  0xe8   :  { %p273_p5 = scmp.ne.s32.totalorder %s351_s3, %s272_s28  ;;  %p276_p6 = scmp.lt.u32.totalorder %s272_s28, %s351_s3 }
  0xea   :  { %p278_p7 = pnand %p276_p6, %p273_p5 }
  0xec   :  { %281 = shalt.err (!%p278_p7)
}
  0xed   :  { %s285_s6 = smov 64   ;;  %s286_s7 = smov 4  }
  0xee   :  { %197 = dma.vmem_to_hbm [thread:$0]  %s192_s25, 512, %s351_s3, [#allocation3], %s285_s6, %s285_s6, %s286_s7  }
  0xef   :  { %282 = dma.done.wait [#allocation3], 512  }
  0xf0   :  { %283 = vsyncadd [#allocation3], 4294966784 }
  0xf1   :  { %201 = vsyncpa [#allocation3], 1 }

</bundles_post_ra>
